<compile_context>
chip_gen: v7x
topology: tpu7x:2x2x1
jax: 0.10.0
libtpu: 0.0.40
codegen_flags: <defaults>
</compile_context>

<pallas_src>
import functools

import jax
import jax.numpy as jnp
from jax import lax
from jax.experimental import pallas as pl
from jax.experimental.pallas import tpu as pltpu


# ----------------------------- fused Pallas kernel ----------------------------

def _ggn_fused_kernel(xe_ref, xw_ref, adj_ref,
                      enc_w_ref, enc_b_ref, enc_wbd_ref, enc_bw_ref,
                      w1_ref, b1_ref, w2_ref, b2_ref,
                      pw1_ref, pb1_ref, pw2_ref, pb2_ref,
                      gpi_ref, nrm_ref, g0_ref, g1_ref,
                      logits_ref, a_ref, *, tau, B, N, K):
    f32 = jnp.float32
    inv_tau = 1.0 / tau

    # ---- encoder stand-in at t = T-1 ----------------------------------------
    # stacked (B*N, D) view -> feeds the GNN heads
    h_st = jnp.dot(xe_ref[...], enc_w_ref[...],
                   preferred_element_type=f32) + enc_b_ref[...]
    # lane-dense (B, N*D) view via block-diag weight -> fake_decoder flatten
    feat = jnp.dot(xw_ref[...], enc_wbd_ref[...],
                   preferred_element_type=f32) + enc_bw_ref[...]

    # ---- mu / sig / pi GNN heads: shared adj@x, one wide first-layer matmul --
    adj = adj_ref[...]
    ax = jnp.concatenate(
        [jnp.dot(adj, h_st[b * N:(b + 1) * N, :], preferred_element_type=f32)
         for b in range(B)], axis=0)                                        # (B*N, D)
    h1 = jnp.maximum(
        jnp.dot(ax, w1_ref[...], preferred_element_type=f32) + b1_ref[...], 0.0)  # (B*N, 3*HID)
    ah = jnp.concatenate(
        [jnp.dot(adj, h1[b * N:(b + 1) * N, :], preferred_element_type=f32)
         for b in range(B)], axis=0)                                        # (B*N, 3*HID)
    heads = jnp.dot(ah, w2_ref[...], preferred_element_type=f32) + b2_ref[...]     # (B*N, 3*K)
    mu = heads[:, 0:K]
    sig = heads[:, K:2 * K]
    pi = heads[:, 2 * K:3 * K]

    # ---- LatentGraphGenerator.update_A (batch folded into sublanes) ----------
    # logits = log(softmax(pi)); soft gumbel-softmax over K mixture components
    pm = jnp.max(pi, axis=-1, keepdims=True)
    ps = pi - pm
    log_sm = ps - jnp.log(jnp.sum(jnp.exp(ps), axis=-1, keepdims=True))
    z = (log_sm + gpi_ref[...]) * inv_tau
    zm = jnp.max(z, axis=-1, keepdims=True)
    ez = jnp.exp(z - zm)
    y = ez * pl.reciprocal(jnp.sum(ez, axis=-1, keepdims=True), approx=True)   # (B*N, K)

    mu_k = jnp.sum(mu * y, axis=-1, keepdims=True)                         # (B*N, 1)
    sig_k = jnp.sum(sig * y, axis=-1, keepdims=True)                       # (B*N, 1)
    s = mu_k + nrm_ref[...] * sig_k                                        # (B*N, 1)

    a_acc = None
    for b in range(B):                                                     # static unroll
        s_b = s[b * N:(b + 1) * N, :]                                      # (N, 1)
        sim = lax.dot_general(s_b, s_b, (((1,), (1,)), ((), ())),
                              preferred_element_type=f32)                  # (N, N) = S S^T
        p = pl.reciprocal(1.0 + jnp.exp(-sim), approx=True)                # sigmoid(sim)
        # 2-category soft gumbel-softmax, channel 0  ==  sigmoid(a0 - a1)
        d = (jnp.log(p + 0.01) - jnp.log(1.01 - p)
             + g0_ref[b] - g1_ref[b]) * inv_tau
        a_b = pl.reciprocal(1.0 + jnp.exp(-d), approx=True)
        a_acc = a_b if a_acc is None else a_acc + a_b
    a_ref[...] = (a_acc * (1.0 / B)).astype(a_ref.dtype)                   # mean over batch

    # ---- fake_decoder flatten + ClassPredictor (eval: dropout = identity) ----
    p1 = jnp.maximum(
        jnp.dot(feat, pw1_ref[...], preferred_element_type=f32) + pb1_ref[...], 0.0)
    out = jnp.dot(p1, pw2_ref[...], preferred_element_type=f32) + pb2_ref[...]
    logits_ref[...] = out.astype(logits_ref.dtype)


# ------------------------------ model glue ------------------------------------

def prepare_fused_params(params, N):
    """One-time host-side re-layout of the weights for the fused kernel."""
    heads = ("mu_nn", "sig_nn", "pi_nn")
    HID = params["mu_nn"]["w1"].shape[1]
    K = params["mu_nn"]["w2"].shape[1]
    C, D = params["enc_w"].shape

    w1c = jnp.concatenate([params[h]["w1"] for h in heads], axis=1)        # (D, 3*HID)
    b1c = jnp.concatenate([params[h]["b1"] for h in heads]).reshape(1, 3 * HID)
    w2bd = jnp.zeros((3 * HID, 3 * K), jnp.float32)                        # block-diag
    for i, h in enumerate(heads):
        w2bd = w2bd.at[i * HID:(i + 1) * HID, i * K:(i + 1) * K].set(params[h]["w2"])
    b2c = jnp.concatenate([params[h]["b2"] for h in heads]).reshape(1, 3 * K)

    return {
        "enc_w": params["enc_w"],
        "enc_b": params["enc_b"].reshape(1, D),
        # (B, N*C) @ block_diag_N(enc_w) == per-node encoder output, flattened (B, N*D)
        "enc_wbd": jnp.kron(jnp.eye(N, dtype=jnp.float32), params["enc_w"]),  # (N*C, N*D)
        "enc_bw": jnp.tile(params["enc_b"], (N,)).reshape(1, N * D),
        "w1c": w1c, "b1c": b1c, "w2bd": w2bd, "b2c": b2c,
        "pred_w1": params["pred_w1"],
        "pred_b1": params["pred_b1"].reshape(1, -1),
        "pred_w2": params["pred_w2"],
        "pred_b2": params["pred_b2"].reshape(1, -1),
    }


def ggn_forward(x, adj, fp, noises, tau):
    """x: (B, C, N, T) -> (class logits (B, num_classes), A (N, N))."""
    B, C, N, T = x.shape
    K = noises["gpi"].shape[-1]
    num_classes = fp["pred_w2"].shape[1]

    # last time step, feature-last.  xe / xw are row-major views of the same slab,
    # so the only HBM work outside the fused kernel is this tiny slice+transpose.
    x_last = jnp.transpose(x[:, :, :, -1], (0, 2, 1))                     # (B, N, C)
    xe = x_last.reshape(B * N, C)                                         # b-major stack
    xw = x_last.reshape(B, N * C)                                         # lane-dense

    gpi = noises["gpi"].reshape(B * N, K)
    nrm = noises["norm"].reshape(B * N, 1)

    vmem = pl.BlockSpec(memory_space=pltpu.MemorySpace.VMEM)
    kernel = functools.partial(_ggn_fused_kernel, tau=float(tau), B=B, N=N, K=K)
    logits, A = pl.pallas_call(
        kernel,
        out_shape=(jax.ShapeDtypeStruct((B, num_classes), jnp.float32),
                   jax.ShapeDtypeStruct((N, N), jnp.float32)),
        in_specs=[vmem] * 19,
        out_specs=(vmem, vmem),
    )(xe, xw, adj,
      fp["enc_w"], fp["enc_b"], fp["enc_wbd"], fp["enc_bw"],
      fp["w1c"], fp["b1c"], fp["w2bd"], fp["b2c"],
      fp["pred_w1"], fp["pred_b1"], fp["pred_w2"], fp["pred_b2"],
      gpi, nrm, noises["g0"], noises["g1"])
    return logits, A


# -------------------------------- main ----------------------------------------

def _uinit(key, shape, fan_in):
    bound = 1.0 / jnp.sqrt(jnp.float32(fan_in))
    return jax.random.uniform(key, shape, jnp.float32, -bound, bound)


if __name__ == "__main__":
    B, C, N, T = 2, 4, 8, 8          # batch, feature_len, nodes, time
    D = 16                            # encoder_hid_dim == decoder_in_dim
    HID = 16                          # lgg_hid_dim
    K = 4                             # lgg_k (mixture components)
    PRED_HID = 32                     # predictor_hid_dim
    NUM_CLASSES = 3                   # predict_class_num
    TAU = 1.0                         # lgg_tau

    root = jax.random.PRNGKey(0)
    ks = jax.random.split(root, 24)

    # fixed adjacency A_0 (symmetric, positive)
    adj_raw = jax.random.uniform(ks[0], (N, N), jnp.float32)
    adj = 0.5 * (adj_raw + adj_raw.T)

    params = {
        "enc_w": _uinit(ks[1], (C, D), C),
        "enc_b": _uinit(ks[2], (D,), C),
        "mu_nn": {"w1": _uinit(ks[3], (D, HID), D), "b1": _uinit(ks[4], (HID,), D),
                  "w2": _uinit(ks[5], (HID, K), HID), "b2": _uinit(ks[6], (K,), HID)},
        "sig_nn": {"w1": _uinit(ks[7], (D, HID), D), "b1": _uinit(ks[8], (HID,), D),
                   "w2": _uinit(ks[9], (HID, K), HID), "b2": _uinit(ks[10], (K,), HID)},
        "pi_nn": {"w1": _uinit(ks[11], (D, HID), D), "b1": _uinit(ks[12], (HID,), D),
                  "w2": _uinit(ks[13], (HID, K), HID), "b2": _uinit(ks[14], (K,), HID)},
        "pred_w1": _uinit(ks[15], (N * D, PRED_HID), N * D),
        "pred_b1": _uinit(ks[16], (PRED_HID,), N * D),
        "pred_w2": _uinit(ks[17], (PRED_HID, NUM_CLASSES), PRED_HID),
        "pred_b2": _uinit(ks[18], (NUM_CLASSES,), PRED_HID),
    }
    fparams = prepare_fused_params(params, N)   # one-time weight re-layout (host side)

    # stochastic draws of update_A (gumbel-softmax + get_norm_noise), made
    # deterministic by sampling host-side with fixed keys.
    noises = {
        "gpi": jax.random.gumbel(ks[19], (B, N, K), jnp.float32),
        "norm": jax.random.normal(ks[20], (B, N, 1), jnp.float32),
        "g0": jax.random.gumbel(ks[21], (B, N, N), jnp.float32),
        "g1": jax.random.gumbel(ks[22], (B, N, N), jnp.float32),
    }

    x = jax.random.normal(ks[23], (B, C, N, T), jnp.float32)

    fwd = jax.jit(functools.partial(ggn_forward, tau=TAU))
    logits, A = fwd(x, adj, fparams, noises)
    jax.block_until_ready((logits, A))

    assert logits.shape == (B, NUM_CLASSES)
    assert A.shape == (N, N)
    assert bool(jnp.all(jnp.isfinite(logits))) and bool(jnp.all(jnp.isfinite(A)))
    print("KERNEL_OK")
</pallas_src>

<mosaic_0001>
module attributes {stable_mosaic.version = 11 : i64} {
  func.func @_ggn_fused_kernel(%arg0: memref<16x4xf32, #tpu.memory_space<vmem>>, %arg1: memref<2x32xf32, #tpu.memory_space<vmem>>, %arg2: memref<8x8xf32, #tpu.memory_space<vmem>>, %arg3: memref<4x16xf32, #tpu.memory_space<vmem>>, %arg4: memref<1x16xf32, #tpu.memory_space<vmem>>, %arg5: memref<32x128xf32, #tpu.memory_space<vmem>>, %arg6: memref<1x128xf32, #tpu.memory_space<vmem>>, %arg7: memref<16x48xf32, #tpu.memory_space<vmem>>, %arg8: memref<1x48xf32, #tpu.memory_space<vmem>>, %arg9: memref<48x12xf32, #tpu.memory_space<vmem>>, %arg10: memref<1x12xf32, #tpu.memory_space<vmem>>, %arg11: memref<128x32xf32, #tpu.memory_space<vmem>>, %arg12: memref<1x32xf32, #tpu.memory_space<vmem>>, %arg13: memref<32x3xf32, #tpu.memory_space<vmem>>, %arg14: memref<1x3xf32, #tpu.memory_space<vmem>>, %arg15: memref<16x4xf32, #tpu.memory_space<vmem>>, %arg16: memref<16x1xf32, #tpu.memory_space<vmem>>, %arg17: memref<2x8x8xf32, #tpu.memory_space<vmem>>, %arg18: memref<2x8x8xf32, #tpu.memory_space<vmem>>, %arg19: memref<2x3xf32, #tpu.memory_space<vmem>>, %arg20: memref<8x8xf32, #tpu.memory_space<vmem>>) attributes {dimension_semantics = [], scalar_prefetch = 0 : i64, scratch_operands = 0 : i64, tpu.core_type = #tpu.core_type<tc>} {
    %c0 = arith.constant 0 : index
    %c0_0 = arith.constant 0 : index
    %0 = vector.load %arg0[%c0, %c0_0] : memref<16x4xf32, #tpu.memory_space<vmem>>, vector<16x4xf32>
    %c0_1 = arith.constant 0 : index
    %c0_2 = arith.constant 0 : index
    %1 = vector.load %arg3[%c0_1, %c0_2] : memref<4x16xf32, #tpu.memory_space<vmem>>, vector<4x16xf32>
    %cst = arith.constant dense<0.000000e+00> : vector<16x16xf32>
    %2 = tpu.matmul %0, %1, %cst {dimension_numbers = #tpu.dot_dimension_numbers<[1], [0], [0], [1], [0, 0, 1, 1], [], []>} : vector<16x4xf32>, vector<4x16xf32>, vector<16x16xf32> -> vector<16x16xf32>
    %c0_3 = arith.constant 0 : index
    %c0_4 = arith.constant 0 : index
    %3 = vector.load %arg4[%c0_3, %c0_4] : memref<1x16xf32, #tpu.memory_space<vmem>>, vector<1x16xf32>
    %4 = vector.broadcast %3 : vector<1x16xf32> to vector<16x16xf32>
    %5 = arith.addf %2, %4 : vector<16x16xf32>
    %c0_5 = arith.constant 0 : index
    %c0_6 = arith.constant 0 : index
    %6 = vector.load %arg1[%c0_5, %c0_6] : memref<2x32xf32, #tpu.memory_space<vmem>>, vector<2x32xf32>
    %c0_7 = arith.constant 0 : index
    %c0_8 = arith.constant 0 : index
    %7 = vector.load %arg5[%c0_7, %c0_8] : memref<32x128xf32, #tpu.memory_space<vmem>>, vector<32x128xf32>
    %cst_9 = arith.constant dense<0.000000e+00> : vector<2x128xf32>
    %8 = tpu.matmul %6, %7, %cst_9 {dimension_numbers = #tpu.dot_dimension_numbers<[1], [0], [0], [1], [0, 0, 1, 1], [], []>} : vector<2x32xf32>, vector<32x128xf32>, vector<2x128xf32> -> vector<2x128xf32>
    %c0_10 = arith.constant 0 : index
    %c0_11 = arith.constant 0 : index
    %9 = vector.load %arg6[%c0_10, %c0_11] : memref<1x128xf32, #tpu.memory_space<vmem>>, vector<1x128xf32>
    %10 = vector.broadcast %9 : vector<1x128xf32> to vector<2x128xf32>
    %11 = arith.addf %8, %10 : vector<2x128xf32>
    %c0_12 = arith.constant 0 : index
    %c0_13 = arith.constant 0 : index
    %12 = vector.load %arg2[%c0_12, %c0_13] : memref<8x8xf32, #tpu.memory_space<vmem>>, vector<8x8xf32>
    %13 = vector.extract_strided_slice %5 {offsets = [0, 0], sizes = [8, 16], strides = [1, 1]} : vector<16x16xf32> to vector<8x16xf32>
    %cst_14 = arith.constant dense<0.000000e+00> : vector<8x16xf32>
    %14 = tpu.matmul %12, %13, %cst_14 {dimension_numbers = #tpu.dot_dimension_numbers<[1], [0], [0], [1], [0, 0, 1, 1], [], []>} : vector<8x8xf32>, vector<8x16xf32>, vector<8x16xf32> -> vector<8x16xf32>
    %15 = vector.extract_strided_slice %5 {offsets = [8, 0], sizes = [8, 16], strides = [1, 1]} : vector<16x16xf32> to vector<8x16xf32>
    %cst_15 = arith.constant dense<0.000000e+00> : vector<8x16xf32>
    %16 = tpu.matmul %12, %15, %cst_15 {dimension_numbers = #tpu.dot_dimension_numbers<[1], [0], [0], [1], [0, 0, 1, 1], [], []>} : vector<8x8xf32>, vector<8x16xf32>, vector<8x16xf32> -> vector<8x16xf32>
    %17 = tpu.concatenate %14, %16 in 0 : vector<8x16xf32>, vector<8x16xf32> -> vector<16x16xf32>
    %c0_16 = arith.constant 0 : index
    %c0_17 = arith.constant 0 : index
    %18 = vector.load %arg7[%c0_16, %c0_17] : memref<16x48xf32, #tpu.memory_space<vmem>>, vector<16x48xf32>
    %cst_18 = arith.constant dense<0.000000e+00> : vector<16x48xf32>
    %19 = tpu.matmul %17, %18, %cst_18 {dimension_numbers = #tpu.dot_dimension_numbers<[1], [0], [0], [1], [0, 0, 1, 1], [], []>} : vector<16x16xf32>, vector<16x48xf32>, vector<16x48xf32> -> vector<16x48xf32>
    %c0_19 = arith.constant 0 : index
    %c0_20 = arith.constant 0 : index
    %20 = vector.load %arg8[%c0_19, %c0_20] : memref<1x48xf32, #tpu.memory_space<vmem>>, vector<1x48xf32>
    %21 = vector.broadcast %20 : vector<1x48xf32> to vector<16x48xf32>
    %22 = arith.addf %19, %21 : vector<16x48xf32>
    %cst_21 = arith.constant 0.000000e+00 : f32
    %23 = vector.broadcast %cst_21 : f32 to vector<16x48xf32>
    %24 = arith.maximumf %22, %23 : vector<16x48xf32>
    %25 = vector.extract_strided_slice %24 {offsets = [0, 0], sizes = [8, 48], strides = [1, 1]} : vector<16x48xf32> to vector<8x48xf32>
    %cst_22 = arith.constant dense<0.000000e+00> : vector<8x48xf32>
    %26 = tpu.matmul %12, %25, %cst_22 {dimension_numbers = #tpu.dot_dimension_numbers<[1], [0], [0], [1], [0, 0, 1, 1], [], []>} : vector<8x8xf32>, vector<8x48xf32>, vector<8x48xf32> -> vector<8x48xf32>
    %27 = vector.extract_strided_slice %24 {offsets = [8, 0], sizes = [8, 48], strides = [1, 1]} : vector<16x48xf32> to vector<8x48xf32>
    %cst_23 = arith.constant dense<0.000000e+00> : vector<8x48xf32>
    %28 = tpu.matmul %12, %27, %cst_23 {dimension_numbers = #tpu.dot_dimension_numbers<[1], [0], [0], [1], [0, 0, 1, 1], [], []>} : vector<8x8xf32>, vector<8x48xf32>, vector<8x48xf32> -> vector<8x48xf32>
    %29 = tpu.concatenate %26, %28 in 0 : vector<8x48xf32>, vector<8x48xf32> -> vector<16x48xf32>
    %c0_24 = arith.constant 0 : index
    %c0_25 = arith.constant 0 : index
    %30 = vector.load %arg9[%c0_24, %c0_25] : memref<48x12xf32, #tpu.memory_space<vmem>>, vector<48x12xf32>
    %cst_26 = arith.constant dense<0.000000e+00> : vector<16x12xf32>
    %31 = tpu.matmul %29, %30, %cst_26 {dimension_numbers = #tpu.dot_dimension_numbers<[1], [0], [0], [1], [0, 0, 1, 1], [], []>} : vector<16x48xf32>, vector<48x12xf32>, vector<16x12xf32> -> vector<16x12xf32>
    %c0_27 = arith.constant 0 : index
    %c0_28 = arith.constant 0 : index
    %32 = vector.load %arg10[%c0_27, %c0_28] : memref<1x12xf32, #tpu.memory_space<vmem>>, vector<1x12xf32>
    %33 = vector.broadcast %32 : vector<1x12xf32> to vector<16x12xf32>
    %34 = arith.addf %31, %33 : vector<16x12xf32>
    %35 = vector.extract_strided_slice %34 {offsets = [0, 0], sizes = [16, 4], strides = [1, 1]} : vector<16x12xf32> to vector<16x4xf32>
    %36 = vector.extract_strided_slice %34 {offsets = [0, 4], sizes = [16, 4], strides = [1, 1]} : vector<16x12xf32> to vector<16x4xf32>
    %37 = vector.extract_strided_slice %34 {offsets = [0, 8], sizes = [16, 4], strides = [1, 1]} : vector<16x12xf32> to vector<16x4xf32>
    %cst_29 = arith.constant dense<0xFF800000> : vector<16xf32>
    %38 = vector.multi_reduction <maximumf>, %37, %cst_29 [1] : vector<16x4xf32> to vector<16xf32>
    %39 = vector.shape_cast %38 : vector<16xf32> to vector<16x1xf32>
    %40 = vector.broadcast %39 : vector<16x1xf32> to vector<16x4xf32>
    %41 = arith.subf %37, %40 : vector<16x4xf32>
    %42 = math.exp %41 : vector<16x4xf32>
    %cst_30 = arith.constant dense<0.000000e+00> : vector<16xf32>
    %43 = vector.multi_reduction <add>, %42, %cst_30 [1] : vector<16x4xf32> to vector<16xf32>
    %44 = vector.shape_cast %43 : vector<16xf32> to vector<16x1xf32>
    %45 = math.log %44 : vector<16x1xf32>
    %46 = vector.broadcast %45 : vector<16x1xf32> to vector<16x4xf32>
    %47 = arith.subf %41, %46 : vector<16x4xf32>
    %c0_31 = arith.constant 0 : index
    %c0_32 = arith.constant 0 : index
    %48 = vector.load %arg15[%c0_31, %c0_32] : memref<16x4xf32, #tpu.memory_space<vmem>>, vector<16x4xf32>
    %49 = arith.addf %47, %48 : vector<16x4xf32>
    %cst_33 = arith.constant 1.000000e+00 : f32
    %50 = vector.broadcast %cst_33 : f32 to vector<16x4xf32>
    %51 = arith.mulf %49, %50 : vector<16x4xf32>
    %cst_34 = arith.constant dense<0xFF800000> : vector<16xf32>
    %52 = vector.multi_reduction <maximumf>, %51, %cst_34 [1] : vector<16x4xf32> to vector<16xf32>
    %53 = vector.shape_cast %52 : vector<16xf32> to vector<16x1xf32>
    %54 = vector.broadcast %53 : vector<16x1xf32> to vector<16x4xf32>
    %55 = arith.subf %51, %54 : vector<16x4xf32>
    %56 = math.exp %55 : vector<16x4xf32>
    %cst_35 = arith.constant dense<0.000000e+00> : vector<16xf32>
    %57 = vector.multi_reduction <add>, %56, %cst_35 [1] : vector<16x4xf32> to vector<16xf32>
    %58 = vector.shape_cast %57 : vector<16xf32> to vector<16x1xf32>
    %59 = tpu.reciprocal %58 {approx = true} : vector<16x1xf32> -> vector<16x1xf32>
    %60 = vector.broadcast %59 : vector<16x1xf32> to vector<16x4xf32>
    %61 = arith.mulf %56, %60 : vector<16x4xf32>
    %62 = arith.mulf %35, %61 : vector<16x4xf32>
    %cst_36 = arith.constant dense<0.000000e+00> : vector<16xf32>
    %63 = vector.multi_reduction <add>, %62, %cst_36 [1] : vector<16x4xf32> to vector<16xf32>
    %64 = vector.shape_cast %63 : vector<16xf32> to vector<16x1xf32>
    %65 = arith.mulf %36, %61 : vector<16x4xf32>
    %cst_37 = arith.constant dense<0.000000e+00> : vector<16xf32>
    %66 = vector.multi_reduction <add>, %65, %cst_37 [1] : vector<16x4xf32> to vector<16xf32>
    %67 = vector.shape_cast %66 : vector<16xf32> to vector<16x1xf32>
    %c0_38 = arith.constant 0 : index
    %c0_39 = arith.constant 0 : index
    %68 = vector.load %arg16[%c0_38, %c0_39] : memref<16x1xf32, #tpu.memory_space<vmem>>, vector<16x1xf32>
    %69 = arith.mulf %68, %67 : vector<16x1xf32>
    %70 = arith.addf %64, %69 : vector<16x1xf32>
    %71 = vector.extract_strided_slice %70 {offsets = [0, 0], sizes = [8, 1], strides = [1, 1]} : vector<16x1xf32> to vector<8x1xf32>
    %cst_40 = arith.constant dense<0.000000e+00> : vector<8x8xf32>
    %72 = tpu.matmul %71, %71, %cst_40 {dimension_numbers = #tpu.dot_dimension_numbers<[1], [1], [0], [0], [0, 0, 1, 0], [], []>} : vector<8x1xf32>, vector<8x1xf32>, vector<8x8xf32> -> vector<8x8xf32>
    %cst_41 = arith.constant 0.000000e+00 : f32
    %73 = vector.broadcast %cst_41 : f32 to vector<8x8xf32>
    %74 = arith.subf %73, %72 : vector<8x8xf32>
    %75 = math.exp %74 : vector<8x8xf32>
    %cst_42 = arith.constant 1.000000e+00 : f32
    %76 = vector.broadcast %cst_42 : f32 to vector<8x8xf32>
    %77 = arith.addf %76, %75 : vector<8x8xf32>
    %78 = tpu.reciprocal %77 {approx = true} : vector<8x8xf32> -> vector<8x8xf32>
    %cst_43 = arith.constant 0.00999999977 : f32
    %79 = vector.broadcast %cst_43 : f32 to vector<8x8xf32>
    %80 = arith.addf %78, %79 : vector<8x8xf32>
    %81 = math.log %80 : vector<8x8xf32>
    %cst_44 = arith.constant 1.010000e+00 : f32
    %82 = vector.broadcast %cst_44 : f32 to vector<8x8xf32>
    %83 = arith.subf %82, %78 : vector<8x8xf32>
    %84 = math.log %83 : vector<8x8xf32>
    %85 = arith.subf %81, %84 : vector<8x8xf32>
    %c0_45 = arith.constant 0 : index
    %c0_46 = arith.constant 0 : index
    %c0_47 = arith.constant 0 : index
    %86 = vector.load %arg17[%c0_45, %c0_46, %c0_47] : memref<2x8x8xf32, #tpu.memory_space<vmem>>, vector<1x8x8xf32>
    %87 = vector.shape_cast %86 : vector<1x8x8xf32> to vector<8x8xf32>
    %88 = arith.addf %85, %87 : vector<8x8xf32>
    %c0_48 = arith.constant 0 : index
    %c0_49 = arith.constant 0 : index
    %c0_50 = arith.constant 0 : index
    %89 = vector.load %arg18[%c0_48, %c0_49, %c0_50] : memref<2x8x8xf32, #tpu.memory_space<vmem>>, vector<1x8x8xf32>
    %90 = vector.shape_cast %89 : vector<1x8x8xf32> to vector<8x8xf32>
    %91 = arith.subf %88, %90 : vector<8x8xf32>
    %cst_51 = arith.constant 1.000000e+00 : f32
    %92 = vector.broadcast %cst_51 : f32 to vector<8x8xf32>
    %93 = arith.mulf %91, %92 : vector<8x8xf32>
    %cst_52 = arith.constant 0.000000e+00 : f32
    %94 = vector.broadcast %cst_52 : f32 to vector<8x8xf32>
    %95 = arith.subf %94, %93 : vector<8x8xf32>
    %96 = math.exp %95 : vector<8x8xf32>
    %cst_53 = arith.constant 1.000000e+00 : f32
    %97 = vector.broadcast %cst_53 : f32 to vector<8x8xf32>
    %98 = arith.addf %97, %96 : vector<8x8xf32>
    %99 = tpu.reciprocal %98 {approx = true} : vector<8x8xf32> -> vector<8x8xf32>
    %100 = vector.extract_strided_slice %70 {offsets = [8, 0], sizes = [8, 1], strides = [1, 1]} : vector<16x1xf32> to vector<8x1xf32>
    %cst_54 = arith.constant dense<0.000000e+00> : vector<8x8xf32>
    %101 = tpu.matmul %100, %100, %cst_54 {dimension_numbers = #tpu.dot_dimension_numbers<[1], [1], [0], [0], [0, 0, 1, 0], [], []>} : vector<8x1xf32>, vector<8x1xf32>, vector<8x8xf32> -> vector<8x8xf32>
    %cst_55 = arith.constant 0.000000e+00 : f32
    %102 = vector.broadcast %cst_55 : f32 to vector<8x8xf32>
    %103 = arith.subf %102, %101 : vector<8x8xf32>
    %104 = math.exp %103 : vector<8x8xf32>
    %cst_56 = arith.constant 1.000000e+00 : f32
    %105 = vector.broadcast %cst_56 : f32 to vector<8x8xf32>
    %106 = arith.addf %105, %104 : vector<8x8xf32>
    %107 = tpu.reciprocal %106 {approx = true} : vector<8x8xf32> -> vector<8x8xf32>
    %cst_57 = arith.constant 0.00999999977 : f32
    %108 = vector.broadcast %cst_57 : f32 to vector<8x8xf32>
    %109 = arith.addf %107, %108 : vector<8x8xf32>
    %110 = math.log %109 : vector<8x8xf32>
    %cst_58 = arith.constant 1.010000e+00 : f32
    %111 = vector.broadcast %cst_58 : f32 to vector<8x8xf32>
    %112 = arith.subf %111, %107 : vector<8x8xf32>
    %113 = math.log %112 : vector<8x8xf32>
    %114 = arith.subf %110, %113 : vector<8x8xf32>
    %c1 = arith.constant 1 : index
    %c0_59 = arith.constant 0 : index
    %c0_60 = arith.constant 0 : index
    %115 = vector.load %arg17[%c1, %c0_59, %c0_60] : memref<2x8x8xf32, #tpu.memory_space<vmem>>, vector<1x8x8xf32>
    %116 = vector.shape_cast %115 : vector<1x8x8xf32> to vector<8x8xf32>
    %117 = arith.addf %114, %116 : vector<8x8xf32>
    %c1_61 = arith.constant 1 : index
    %c0_62 = arith.constant 0 : index
    %c0_63 = arith.constant 0 : index
    %118 = vector.load %arg18[%c1_61, %c0_62, %c0_63] : memref<2x8x8xf32, #tpu.memory_space<vmem>>, vector<1x8x8xf32>
    %119 = vector.shape_cast %118 : vector<1x8x8xf32> to vector<8x8xf32>
    %120 = arith.subf %117, %119 : vector<8x8xf32>
    %cst_64 = arith.constant 1.000000e+00 : f32
    %121 = vector.broadcast %cst_64 : f32 to vector<8x8xf32>
    %122 = arith.mulf %120, %121 : vector<8x8xf32>
    %cst_65 = arith.constant 0.000000e+00 : f32
    %123 = vector.broadcast %cst_65 : f32 to vector<8x8xf32>
    %124 = arith.subf %123, %122 : vector<8x8xf32>
    %125 = math.exp %124 : vector<8x8xf32>
    %cst_66 = arith.constant 1.000000e+00 : f32
    %126 = vector.broadcast %cst_66 : f32 to vector<8x8xf32>
    %127 = arith.addf %126, %125 : vector<8x8xf32>
    %128 = tpu.reciprocal %127 {approx = true} : vector<8x8xf32> -> vector<8x8xf32>
    %129 = arith.addf %99, %128 : vector<8x8xf32>
    %cst_67 = arith.constant 5.000000e-01 : f32
    %130 = vector.broadcast %cst_67 : f32 to vector<8x8xf32>
    %131 = arith.mulf %129, %130 : vector<8x8xf32>
    %c0_68 = arith.constant 0 : index
    %c0_69 = arith.constant 0 : index
    %132 = vector.load %arg20[%c0_68, %c0_69] : memref<8x8xf32, #tpu.memory_space<vmem>>, vector<8x8xf32>
    tpu.vector_store %arg20[%c0_68, %c0_69], %131 {strides = array<i32>} : memref<8x8xf32, #tpu.memory_space<vmem>>, vector<8x8xf32>,
    %c0_70 = arith.constant 0 : index
    %c0_71 = arith.constant 0 : index
    %133 = vector.load %arg11[%c0_70, %c0_71] : memref<128x32xf32, #tpu.memory_space<vmem>>, vector<128x32xf32>
    %cst_72 = arith.constant dense<0.000000e+00> : vector<2x32xf32>
    %134 = tpu.matmul %11, %133, %cst_72 {dimension_numbers = #tpu.dot_dimension_numbers<[1], [0], [0], [1], [0, 0, 1, 1], [], []>} : vector<2x128xf32>, vector<128x32xf32>, vector<2x32xf32> -> vector<2x32xf32>
    %c0_73 = arith.constant 0 : index
    %c0_74 = arith.constant 0 : index
    %135 = vector.load %arg12[%c0_73, %c0_74] : memref<1x32xf32, #tpu.memory_space<vmem>>, vector<1x32xf32>
    %136 = vector.broadcast %135 : vector<1x32xf32> to vector<2x32xf32>
    %137 = arith.addf %134, %136 : vector<2x32xf32>
    %cst_75 = arith.constant 0.000000e+00 : f32
    %138 = vector.broadcast %cst_75 : f32 to vector<2x32xf32>
    %139 = arith.maximumf %137, %138 : vector<2x32xf32>
    %c0_76 = arith.constant 0 : index
    %c0_77 = arith.constant 0 : index
    %140 = vector.load %arg13[%c0_76, %c0_77] : memref<32x3xf32, #tpu.memory_space<vmem>>, vector<32x3xf32>
    %cst_78 = arith.constant dense<0.000000e+00> : vector<2x3xf32>
    %141 = tpu.matmul %139, %140, %cst_78 {dimension_numbers = #tpu.dot_dimension_numbers<[1], [0], [0], [1], [0, 0, 1, 1], [], []>} : vector<2x32xf32>, vector<32x3xf32>, vector<2x3xf32> -> vector<2x3xf32>
    %c0_79 = arith.constant 0 : index
    %c0_80 = arith.constant 0 : index
    %142 = vector.load %arg14[%c0_79, %c0_80] : memref<1x3xf32, #tpu.memory_space<vmem>>, vector<1x3xf32>
    %143 = vector.broadcast %142 : vector<1x3xf32> to vector<2x3xf32>
    %144 = arith.addf %141, %143 : vector<2x3xf32>
    %c0_81 = arith.constant 0 : index
    %c0_82 = arith.constant 0 : index
    %145 = vector.load %arg19[%c0_81, %c0_82] : memref<2x3xf32, #tpu.memory_space<vmem>>, vector<2x3xf32>
    tpu.vector_store %arg19[%c0_81, %c0_82], %144 {strides = array<i32>} : memref<2x3xf32, #tpu.memory_space<vmem>>, vector<2x3xf32>,
    return
  }
}

</mosaic_0001>

<bundles_post_ra>
// kernel: ggn_forward.1
= control target key start
LH: loop header
LB: loop body
LE: loop exit
PB: predicated region body
PF: predicated region fallthrough
CT: control target
= control target key end

     0   :  { %s1955_s0 = inlined_call_operand.vmem [shape: f32[16,4], index: 0, kind: input, shape index: {}]   ;;  %s1956_s1 = inlined_call_operand.vmem [shape: f32[2,32], index: 1, kind: input, shape index: {}]   ;;  %s1957_s2 = inlined_call_operand.vmem [shape: f32[8,8], index: 2, kind: input, shape index: {}]   ;;  %s1958_s3 = inlined_call_operand.vmem [shape: f32[4,16], index: 3, kind: input, shape index: {}]   ;;  %s1959_s4 = inlined_call_operand.vmem [shape: f32[1,16], index: 4, kind: input, shape index: {}]   ;;  %s1960_s5 = inlined_call_operand.vmem [shape: f32[32,128], index: 5, kind: input, shape index: {}]   ;;  %s1961_s6 = inlined_call_operand.vmem [shape: f32[1,128], index: 6, kind: input, shape index: {}]   ;;  %s1962_s7 = inlined_call_operand.vmem [shape: f32[16,48], index: 7, kind: input, shape index: {}]   ;;  %s1963_s8 = inlined_call_operand.vmem [shape: f32[1,48], index: 8, kind: input, shape index: {}]   ;;  %s1964_s9 = inlined_call_operand.vmem [shape: f32[48,12], index: 9, kind: input, shape index: {}]   ;;  %s1965_s10 = inlined_call_operand.vmem [shape: f32[1,12], index: 10, kind: input, shape index: {}]   ;;  %s1966_s11 = inlined_call_operand.vmem [shape: f32[128,32], index: 11, kind: input, shape index: {}]   ;;  %s1967_s12 = inlined_call_operand.vmem [shape: f32[1,32], index: 12, kind: input, shape index: {}]   ;;  %s1968_s13 = inlined_call_operand.vmem [shape: f32[32,3], index: 13, kind: input, shape index: {}]   ;;  %s1969_s14 = inlined_call_operand.vmem [shape: f32[1,3], index: 14, kind: input, shape index: {}]   ;;  %s1970_s15 = inlined_call_operand.vmem [shape: f32[16,4], index: 15, kind: input, shape index: {}]   ;;  %s1971_s16 = inlined_call_operand.vmem [shape: f32[16,1], index: 16, kind: input, shape index: {}]   ;;  %s1972_s17 = inlined_call_operand.vmem [shape: f32[2,8,8], index: 17, kind: input, shape index: {}]   ;;  %s1973_s18 = inlined_call_operand.vmem [shape: f32[2,8,8], index: 18, kind: input, shape index: {}]   ;;  %s1974_s19 = inlined_call_operand.hbm [shape: f32[2,3], index: 19, kind: output, shape index: {0}]   ;;  %s1975_s20 = inlined_call_operand.hbm [shape: f32[8,8], index: 20, kind: output, shape index: {1}]  }
   0x1   :  { %1977 = sst [smem:[#allocation8_spill]] %s1955_s0 }
   0x2   :  { %1978 = sst [smem:[#allocation9_spill]] %s1956_s1 }
   0x3   :  { %1979 = sst [smem:[#allocation10_spill]] %s1957_s2 }
   0x4   :  { %1980 = sst [smem:[#allocation11_spill]] %s1958_s3 }
   0x5   :  { %1981 = sst [smem:[#allocation12_spill]] %s1959_s4 }
   0x6   :  { %26 = vsyncpa [#allocation3], 0  ;;  %s1982_s23 = sld [smem:[#allocation11_spill]]  ;;  %vm83_vm0 = vcmask 1043456   ;;  %s1983_s25 = sld [smem:[#allocation8_spill]]  ;;  %vm76_vm1 = vcmask 31744  }
   0x7   :  { %v163_v3 = vld [vmem:[%s1960_s5] sm:$0xff]  ;;  %v164_v4 = vld [vmem:[%s1960_s5 + $0x8] sm:$0xff]  ;;  %v165_v5 = vld [vmem:[%s1960_s5 + $0x10] sm:$0xff]  ;;  %v1583_v8 = vmov 0.0  }
   0x8   :  { %v1436_v6 = vpack.c.bf16 %v164_v4, %v163_v3  ;;  %v166_v7 = vld [vmem:[%s1960_s5 + $0x18] sm:$0xff]  ;;  %1359 = vmatprep.subr.mxu1 %v1583_v8 }
   0xc   :  { %v68_v0 = vld [vmem:[%s1982_s23] sm:$0xf]  ;;  %v67_v2 = vld [vmem:[%s1983_s25 + $0x8] sm:$0xff] }
   0xd   :  { %v66_v1 = vld [vmem:[%s1983_s25] sm:$0xff]  ;;  %1321 = vmatprep.subr.msk.mxu0 %vm83_vm0, %v68_v0 }
   0xe   :  { %1323 = vmatprep.mubr.msk.f32.mxu0 %vm76_vm1, %v66_v1  ;;  %1322 = vmatpush3.msk.msra.mxu0 %vm83_vm0, %v68_v0 }
   0xf   :  { %27 = vsyncpa [#allocation5], 0  ;;  %1324 = vmatmul.mubr.msk.f32.vlgmr.msra.gmra.mrb[0].mxu0 %vm76_vm1, %v67_v2  ;;  %v1584_v9 = vmov 0.0|0.0   ;;  %v1439_v10 = vpack.c.bf16 %v166_v7, %v165_v5  ;;  %vm1585_vm2 = vmmov 0   ;;  %s1984_s23 = sld [smem:[#allocation9_spill]]  ;;  %vm174_vm3 = vcmask 261120  }
  0x10   :  { %1435 = vmatprep.subr.bf16.mxu0 %v1584_v9  ;;  %1334 = vmatprep.mubr.msk.f32.mxu0 %vm1585_vm2, %v1583_v8  ;;  %s1985_s25 = sld [smem:[#allocation12_spill]]  ;;  %s1986_s27 = sld [smem:[#allocation10_spill]]  ;;  %vm249_vm4 = vcmask 64512   ;;  %v393_v20 = vld [vmem:[%s1962_s7] sm:$0xff]  ;;  %v394_v21 = vld [vmem:[%s1962_s7 + $0x8] sm:$0xff]  ;;  %vm402_vm5 = vcmask 130048  }
  0x11   :  { %1437 = vmatpush3.bf16.msra.mxu0 %v1436_v6  ;;  %1361 = vmatprep.mubr.msk.f32.mxu1 %vm1585_vm2, %v1583_v8  ;;  %v1441_v22 = vpack.c.bf16 %v394_v21, %v393_v20  ;;  %v1250_v27 = vld [vmem:[%s1963_s8] ss:$0 sm:$0xff]  ;;  %v627_v30 = vld [vmem:[%s1964_s9 + $0x8] sm:$0xff]  ;;  %v628_v34 = vld [vmem:[%s1964_s9 + $0x10] sm:$0xff]  ;;  %vm639_vm6 = vcmask 392192   ;;  %vm721_vm7 = vcmask 97344  }
  0x12   :  { %1438 = vmatprep.subr.bf16.mxu0 %v1584_v9  ;;  %v626_v29 = vld [vmem:[%s1964_s9] sm:$0xff]  ;;  %v629_v35 = vld [vmem:[%s1964_s9 + $0x18] sm:$0xff]  ;;  %v631_v41 = vld [vmem:[%s1964_s9 + $0x28] sm:$0xff]  ;;  %s1587_s30 = smov 8   ;;  %vm840_vm8 = vcmask 7168  }
  0x13   :  { %v1445_v37 = vpack.c.bf16 %v627_v30, %v626_v29  ;;  %v1449_v39 = vpack.c.bf16 %v629_v35, %v628_v34  ;;  %v630_v40 = vld [vmem:[%s1964_s9 + $0x20] sm:$0xff]  ;;  %v755_v3 = vld [vmem:[%s1970_s15 + $0x8] sm:$0xff] }
  0x14   :  { %v1453_v42 = vpack.c.bf16 %v631_v41, %v630_v40  ;;  %v1255_v47 = vld [vmem:[%s1965_s10] ss:$0 sm:$0xff]  ;;  %s1586_s10 = smov 120  }
  0x15   :  { %1440 = vmatpush3.bf16.msra.mxu0 %v1439_v10  ;;  %v162_v11 = vld [vmem:[%s1984_s23] sm:$0x3] }
  0x16   :  { %1337 = vmatprep.subr.mxu0 %v1583_v8  ;;  %v1242_v12 = vld [vmem:[%s1985_s25] ss:$0 sm:$0xff] }
  0x17   :  { %v248_v16 = vld [vmem:[%s1986_s27] sm:$0xff] }
  0x18   :  { %1335 = vmatmul.mubr.msk.f32.vlgmr.msra.gmra.mrb[2].mxu0 %vm174_vm3, %v162_v11  ;;  %v754_v2 = vld [vmem:[%s1970_s15] sm:$0xff]  ;;  %s1588_s15 = smov 124  }
  0x19   :  { %1339 = vmatprep.mubr.msk.f32.mxu0 %vm1585_vm2, %v1583_v8 }
  0xe2   :  { %v1325_v13 = vpop.f32.mrb[0].mxu0 }
  0xe3   :  { %v153_v14 = vpop.f32.mrb[1].mxu0  ;;  %v159_v17 = vadd.f32 %v1325_v13, %v1242_v12 }
  0xe4   :  { %v154_v15 = vadd.f32 %v1242_v12, %v153_v14 }
  0xe6   :  { %1338 = vmatpush3.msra.mxu0 %v154_v15 }
  0xe7   :  { %1340 = vmatmul.mubr.msk.f32.vlgmr.msra.gmra.mrb[4].mxu0 %vm249_vm4, %v248_v16  ;;  %1342 = vmatprep.subr.mxu0 %v1583_v8 }
  0xe8   :  { %1343 = vmatpush3.msra.mxu0 %v159_v17  ;;  %1344 = vmatprep.mubr.msk.f32.mxu0 %vm1585_vm2, %v1583_v8 }
  0xe9   :  { %1442 = vmatprep.subr.bf16.mxu0 %v1441_v22 }
  0xeb   :  { %1345 = vmatmul.mubr.msk.f32.vlgmr.msra.gmra.mrb[6].mxu0 %vm249_vm4, %v248_v16  ;;  %v1744_v18 = vpop.f32.mrb[2].mxu0 }
  0xec   :  { %v1336_v19 = vpop.f32.mrb[3].mxu0  ;;  %1444 = vmatpush3.bf16.msra.mxu0 %v1441_v22 }
  0xed   :  { %1354 = vmatprep.subr.mxu0 %v1583_v8 }
 0x1ba   :  { %v319_v23 = vpop.f32.mrb[4].mxu0 }
 0x1bb   :  { %v1341_v24 = vpop.f32.mrb[5].mxu0  ;;  %1351 = vmatprep.mubr.msk.f32.mxu0 %vm402_vm5, %v319_v23 }
 0x1be   :  { %v389_v25 = vpop.f32.mrb[6].mxu0 }
 0x1bf   :  { %v1346_v26 = vpop.f32.mrb[7].mxu0  ;;  %1352 = vmatmul.mubr.msk.f32.vlgmr.msra.gmra.mrb[8].mxu0 %vm402_vm5, %v389_v25 }
 0x1c0   :  { %1356 = vmatprep.mubr.msk.f32.mxu0 %vm1585_vm2, %v1583_v8 }
 0x292   :  { %v1353_v28 = vpop.f32.mrb[8].mxu0 }
 0x293   :  { %v481_v31 = vadd.f32 %v1353_v28, %v1250_v27  ;;  %v475_v32 = vpop.f32.mrb[9].mxu0 }
 0x294   :  { %v476_v33 = vadd.f32 %v1250_v27, %v475_v32 }
 0x295   :  { %v485_v36 = vmax.f32 %v481_v31, 0.0 }
 0x296   :  { %v484_v38 = vmax.f32 %v476_v33, 0.0 }
 0x297   :  { %1360 = vmatpush3.msra.mxu1 %v485_v36 }
 0x298   :  { %1355 = vmatpush3.msra.mxu0 %v484_v38  ;;  %1362 = vmatmul.mubr.msk.f32.vlgmr.msra.gmra.mrb[0].mxu1 %vm249_vm4, %v248_v16 }
 0x299   :  { %1357 = vmatmul.mubr.msk.f32.vlgmr.msra.gmra.mrb[10].mxu0 %vm249_vm4, %v248_v16  ;;  %1446 = vmatprep.subr.bf16.mxu0 %v1445_v37 }
 0x29a   :  { %1448 = vmatpush3.bf16.msra.mxu0 %v1445_v37  ;;  %1379 = vmatprep.subr.mxu1 %v1583_v8 }
 0x29b   :  { %1450 = vmatprep.subr.bf16.mxu0 %v1449_v39  ;;  %1381 = vmatprep.mubr.msk.f32.mxu1 %vm1585_vm2, %v1583_v8 }
 0x29e   :  { %1452 = vmatpush3.bf16.msra.mxu0 %v1449_v39 }
 0x29f   :  { %1454 = vmatprep.subr.bf16.mxu0 %v1453_v42 }
 0x2a2   :  { %1456 = vmatpush3.bf16.msra.mxu0 %v1453_v42 }
 0x2a3   :  { %1481 = vmatprep.subr.bf16.mxu0 %v1584_v9 }
 0x36b   :  { %v622_v43 = vpop.f32.mrb[0].mxu1 }
 0x36c   :  { %v552_v44 = vpop.f32.mrb[10].mxu0  ;;  %v1363_v45 = vpop.f32.mrb[1].mxu1 }
 0x36d   :  { %1376 = vmatprep.mubr.msk.f32.mxu0 %vm639_vm6, %v552_v44  ;;  %v1358_v46 = vpop.f32.mrb[11].mxu0 }
 0x36e   :  { %1377 = vmatmul.mubr.msk.f32.vlgmr.msra.gmra.mrb[12].mxu0 %vm639_vm6, %v622_v43 }
 0x36f   :  { %1432 = vmatprep.mubr.msk.f32.mxu0 %vm1585_vm2, %v1583_v8 }
 0x441   :  { %v1378_v48 = vpop.f32.mrb[12].mxu0 }
 0x442   :  { %v712_v49 = vpop.f32.mrb[13].mxu0  ;;  %v1789_v51 = vadd.f32 %v1378_v48, %v1255_v47 }
 0x443   :  { %v1787_v50 = vadd.f32 %v1255_v47, %v712_v49 }
 0x444   :  { %v725_v53 = vsel %vm721_vm7, %v1789_v51, -inf }
 0x445   :  { %v722_v52 = vsel %vm721_vm7, %v1787_v50, -inf }
 0x446   :  { %723 = vmax.xlane.f32.xlu0 %v722_v52 }
 0x44a   :  { %726 = vmax.xlane.f32.xlu0 %v725_v53 }
 0x4d3   :  { %v724_v54 = vpop.xlane.xlu0 %723 }
 0x4d4   :  { %v728_v55 = vsub.f32 %v1787_v50, %v724_v54 }
 0x4d6   :  { %v730_v56 = vmul.f32 1.442695, %v728_v55 }
 0x4d7   :  { %v727_v57 = vpop.xlane.xlu0 %726 }
 0x4d8   :  { %1495 = vpow2.f32 %v730_v56  ;;  %v729_v58 = vsub.f32 %v1789_v51, %v727_v57 }
 0x4da   :  { %v732_v59 = vmul.f32 1.442695, %v729_v58 }
 0x4dc   :  { %1497 = vpow2.f32 %v732_v59  ;;  %v835_v59 = vld [vmem:[%s1971_s16 + $0x8] sm:$0xff] }
 0x4e2   :  { %v1496_v60 = vpop.eup %1495 }
 0x4e3   :  { %736 = vrot.lane.b32.xlu1 %v1496_v60, %s1586_s10 }
 0x4e6   :  { %v1498_v61 = vpop.eup %1497 }
 0x4e7   :  { %738 = vrot.lane.b32.xlu1 %v1498_v61, %s1586_s10 }
 0x555   :  { %v737_v62 = vpop.permute.xlu1 %736 }
 0x556   :  { %v742_v63 = vsel %vm76_vm1, %v737_v62, 0.0  ;;  %v1034_v62 = vld [vmem:[%s1966_s11] sm:$0xff] }
 0x557   :  { %743 = vadd.xlane.f32.xlu0 %v742_v63  ;;  %v1035_v63 = vld [vmem:[%s1966_s11 + $0x8] sm:$0xff] }
 0x559   :  { %v739_v0 = vpop.permute.xlu1 %738 }
 0x55a   :  { %v745_v1 = vsel %vm76_vm1, %v739_v0, 0.0 }
 0x55b   :  { %746 = vadd.xlane.f32.xlu1 %v745_v1  ;;  %v1458_v1 = vpack.c.bf16 %v1035_v63, %v1034_v62 }
 0x56d   :  { %758 = vrot.lane.b32.xlu0 %v754_v2, %s1587_s30  ;;  %v1036_v2 = vld [vmem:[%s1966_s11 + $0x10] sm:$0xff] }
 0x571   :  { %760 = vrot.lane.b32.xlu0 %v755_v3, %s1587_s30  ;;  %v1037_v3 = vld [vmem:[%s1966_s11 + $0x18] sm:$0xff] }
 0x5e4   :  { %v744_v4 = vpop.xlane.xlu0 %743 }
 0x5e5   :  { %1499 = vlog2.f32 %v744_v4  ;;  %v1461_v4 = vpack.c.bf16 %v1037_v3, %v1036_v2  ;;  %v1262_v3 = vld [vmem:[%s1972_s17 + $0x8] sm:$0xff] }
 0x5e8   :  { %v747_v5 = vpop.xlane.xlu1 %746  ;;  %v759_v7 = vpop.permute.xlu0 %758 }
 0x5e9   :  { %1501 = vlog2.f32 %v747_v5  ;;  %v1038_v5 = vld [vmem:[%s1966_s11 + $0x20] sm:$0xff] }
 0x5ec   :  { %v761_v15 = vpop.permute.xlu0 %760 }
 0x5ef   :  { %v1500_v6 = vpop.eup %1499 }
 0x5f0   :  { %v749_v10 = vmul.f32 0.6931472, %v1500_v6  ;;  %v1039_v6 = vld [vmem:[%s1966_s11 + $0x28] sm:$0xff] }
 0x5f2   :  { %v752_v11 = vsub.f32 %v728_v55, %v749_v10  ;;  %v1040_v10 = vld [vmem:[%s1966_s11 + $0x30] sm:$0xff] }
 0x5f3   :  { %v1502_v12 = vpop.eup %1501 }
 0x5f4   :  { %v751_v13 = vmul.f32 0.6931472, %v1502_v12  ;;  %v764_v14 = vadd.f32 %v759_v7, %v752_v11  ;;  %v1464_v7 = vpack.c.bf16 %v1039_v6, %v1038_v5  ;;  %v1042_v12 = vld [vmem:[%s1966_s11 + $0x40] sm:$0xff]  ;;  %v1263_v6 = vld [vmem:[%s1973_s18 + $0x8] sm:$0xff] }
 0x5f6   :  { %v766_v16 = vsel %vm721_vm7, %v764_v14, -inf  ;;  %v753_v17 = vsub.f32 %v729_v58, %v751_v13  ;;  %v1043_v13 = vld [vmem:[%s1966_s11 + $0x48] sm:$0xff] }
 0x5f7   :  { %767 = vmax.xlane.f32.xlu0 %v766_v16  ;;  %v1045_v16 = vld [vmem:[%s1966_s11 + $0x58] sm:$0xff] }
 0x5f8   :  { %v765_v19 = vadd.f32 %v761_v15, %v753_v17  ;;  %v1044_v15 = vld [vmem:[%s1966_s11 + $0x50] sm:$0xff] }
 0x5f9   :  { %v1473_v17 = vpack.c.bf16 %v1045_v16, %v1044_v15 }
 0x5fa   :  { %v769_v20 = vsel %vm721_vm7, %v765_v19, -inf }
 0x5fb   :  { %770 = vmax.xlane.f32.xlu1 %v769_v20  ;;  %v1047_v20 = vld [vmem:[%s1966_s11 + $0x68] sm:$0xff] }
 0x684   :  { %v768_v21 = vpop.xlane.xlu0 %767 }
 0x685   :  { %v772_v22 = vsub.f32 %v764_v14, %v768_v21  ;;  %v1470_v14 = vpack.c.bf16 %v1043_v13, %v1042_v12 }
 0x687   :  { %v774_v23 = vmul.f32 1.442695, %v772_v22  ;;  %v1048_v22 = vld [vmem:[%s1966_s11 + $0x70] sm:$0xff] }
 0x688   :  { %v771_v24 = vpop.xlane.xlu1 %770 }
 0x689   :  { %1503 = vpow2.f32 %v774_v23  ;;  %v773_v25 = vsub.f32 %v765_v19, %v771_v24  ;;  %v1046_v19 = vld [vmem:[%s1966_s11 + $0x60] sm:$0xff]  ;;  %v1049_v23 = vld [vmem:[%s1966_s11 + $0x78] sm:$0xff] }
 0x68a   :  { %v1476_v21 = vpack.c.bf16 %v1047_v20, %v1046_v19  ;;  %v1479_v24 = vpack.c.bf16 %v1049_v23, %v1048_v22 }
 0x68b   :  { %v776_v26 = vmul.f32 1.442695, %v773_v25  ;;  %v1246_v25 = vld [vmem:[%s1961_s6] ss:$0 sm:$0xff] }
 0x68d   :  { %1505 = vpow2.f32 %v776_v26  ;;  %v245_v26 = vadd.f32 %v1246_v25, %v1744_v18  ;;  %v1131_v18 = vld [vmem:[%s1968_s13 + $0x18] sm:$0xff] }
 0x693   :  { %v1504_v27 = vpop.eup %1503 }
 0x694   :  { %780 = vrot.lane.b32.xlu1 %v1504_v27, %s1586_s10 }
 0x697   :  { %v1506_v28 = vpop.eup %1505 }
 0x698   :  { %782 = vrot.lane.b32.xlu1 %v1506_v28, %s1586_s10 }
 0x706   :  { %v781_v29 = vpop.permute.xlu1 %780 }
 0x707   :  { %v786_v30 = vsel %vm76_vm1, %v781_v29, 0.0 }
 0x708   :  { %787 = vadd.xlane.f32.xlu0 %v786_v30  ;;  %v1130_v30 = vld [vmem:[%s1968_s13 + $0x10] sm:$0xff] }
 0x70a   :  { %v783_v31 = vpop.permute.xlu1 %782 }
 0x70b   :  { %v789_v32 = vsel %vm76_vm1, %v783_v31, 0.0  ;;  %v1485_v31 = vpack.c.bf16 %v1131_v18, %v1130_v30 }
 0x70c   :  { %790 = vadd.xlane.f32.xlu1 %v789_v32 }
 0x795   :  { %v788_v33 = vpop.xlane.xlu0 %787 }
 0x796   :  { %1507 = vrcp.f32 %v788_v33 }
 0x799   :  { %v791_v34 = vpop.xlane.xlu1 %790 }
 0x79a   :  { %1509 = vrcp.f32 %v791_v34 }
 0x7a0   :  { %v1508_v35 = vpop.eup %1507 }
 0x7a1   :  { %v794_v36 = vmul.f32 %v1508_v35, %v1504_v27  ;;  %v1128_v27 = vld [vmem:[%s1968_s13] sm:$0xff] }
 0x7a3   :  { %812 = vrot.lane.b32.xlu0 %v794_v36, %s1588_s15 }
 0x7a4   :  { %v1510_v37 = vpop.eup %1509 }
 0x7a5   :  { %v795_v38 = vmul.f32 %v1510_v37, %v1506_v28  ;;  %v1129_v28 = vld [vmem:[%s1968_s13 + $0x8] sm:$0xff] }
 0x7a6   :  { %v1482_v29 = vpack.c.bf16 %v1129_v28, %v1128_v27 }
 0x7a7   :  { %800 = vrot.lane.b32.xlu1 %v795_v38, %s1586_s10  ;;  %814 = vrot.lane.b32.xlu0 %v795_v38, %s1588_s15 }
 0x7a8   :  { %1483 = vmatpush3.bf16.msra.mxu0 %v1482_v29 }
 0x7a9   :  { %1484 = vmatprep.subr.bf16.mxu0 %v1584_v9 }
 0x7ab   :  { %798 = vrot.lane.b32.xlu0 %v794_v36, %s1586_s10 }
 0x7ac   :  { %1486 = vmatpush3.bf16.msra.mxu0 %v1485_v31 }
 0x815   :  { %v813_v39 = vpop.permute.xlu0 %812 }
 0x816   :  { %v818_v40 = vmul.f32 %v813_v39, %v1787_v50 }
 0x818   :  { %822 = vrot.lane.b32.xlu0 %v818_v40, %s1588_s15 }
 0x819   :  { %v815_v41 = vpop.permute.xlu0 %814  ;;  %v801_v48 = vpop.permute.xlu1 %800 }
 0x81a   :  { %v819_v42 = vmul.f32 %v815_v41, %v1789_v51  ;;  %v805_v52 = vmul.f32 %v801_v48, %v1789_v51 }
 0x81c   :  { %824 = vrot.lane.b32.xlu0 %v819_v42, %s1588_s15  ;;  %v809_v54 = vsel %vm76_vm1, %v805_v52, 0.0 }
 0x81d   :  { %v799_v43 = vpop.permute.xlu0 %798 }
 0x81e   :  { %v804_v44 = vmul.f32 %v799_v43, %v1787_v50  ;;  %v834_v50 = vld [vmem:[%s1971_s16] sm:$0xff] }
 0x820   :  { %v806_v45 = vsel %vm76_vm1, %v804_v44, 0.0 }
 0x821   :  { %807 = vadd.xlane.f32.xlu1 %v806_v45 }
 0x88a   :  { %v823_v46 = vpop.permute.xlu0 %822 }
 0x88b   :  { %v828_v47 = vsel %vm76_vm1, %v823_v46, 0.0 }
 0x88c   :  { %829 = vadd.xlane.f32.xlu0 %v828_v47 }
 0x88e   :  { %v825_v49 = vpop.permute.xlu0 %824 }
 0x88f   :  { %v831_v53 = vsel %vm76_vm1, %v825_v49, 0.0  ;;  %v1264_v49 = vld [vmem:[%s1967_s12] ss:$0 sm:$0xff] }
 0x890   :  { %832 = vadd.xlane.f32.xlu0 %v831_v53 }
 0x894   :  { %810 = vadd.xlane.f32.xlu0 %v809_v54 }
 0x8ae   :  { %v808_v57 = vpop.xlane.xlu1 %807 }
 0x919   :  { %v830_v55 = vpop.xlane.xlu0 %829 }
 0x91a   :  { %v836_v56 = vmul.f32 %v834_v50, %v830_v55 }
 0x91c   :  { %v838_v58 = vadd.f32 %v836_v56, %v808_v57 }
 0x91d   :  { %v833_v51 = vpop.xlane.xlu0 %832 }
 0x91e   :  { %1380 = vmatpush3.xpose.msk.msra.mxu1 %vm840_vm8, %v838_v58  ;;  %v837_v60 = vmul.f32 %v835_v59, %v833_v51  ;;  %v926_v59 = vld [vmem:[%s1972_s17] sm:$0xff]  ;;  %s1589_s17 = smov [#allocation4]  }
 0x91f   :  { %1384 = vmatprep.subr.mxu1 %v1583_v8 }
 0x921   :  { %1382 = vmatmul.mubr.msk.f32.vlgmr.msra.gmra.mrb[2].mxu1 %vm840_vm8, %v838_v58  ;;  %v811_v61 = vpop.xlane.xlu0 %810 }
 0x922   :  { %v839_v0 = vadd.f32 %v837_v60, %v811_v61  ;;  %1386 = vmatprep.mubr.msk.f32.mxu1 %vm1585_vm2, %v1583_v8  ;;  %v928_v60 = vld [vmem:[%s1973_s18] sm:$0xff]  ;;  %s1230_s18 = sshll.u32 %s1589_s17, 4  ;;  %s1231_s18 = int_to_ptr.vmem [resolvable:$true] %s1230_s18 }
 0x923   :  { %s1535_s16 = scalar_lea.vmem %s1231_s18, 128  ;;  %p1540_p1 = scmp.lt.s32.totalorder %s1231_s18, %s1231_s18 }
 0x924   :  { %1385 = vmatpush3.xpose.msk.msra.mxu1 %vm840_vm8, %v839_v0  ;;  %p1536_p0 = scmp.ne.s32.totalorder %s1231_s18, %s1535_s16  ;;  %p1541_p2 = scmp.lt.s32.totalorder %s1535_s16, %s1535_s16 }
 0x925   :  { %1457 = vmatprep.subr.bf16.mxu1 %v1584_v9 }
 0x926   :  { %p1542_p3 = por %p1541_p2, %p1540_p1 }
 0x927   :  { %1387 = vmatmul.mubr.msk.f32.vlgmr.msra.gmra.mrb[4].mxu1 %vm840_vm8, %v839_v0 }
 0x928   :  { %1459 = vmatpush3.bf16.msra.mxu1 %v1458_v1  ;;  %1421 = vmatprep.mubr.msk.f32.mxu1 %vm1585_vm2, %v1583_v8  ;;  %v1041_v8 = vld [vmem:[%s1966_s11 + $0x38] sm:$0xff]  ;;  %p1543_p4 = pnand %p1542_p3, %p1536_p0 }
 0x929   :  { %1460 = vmatprep.subr.bf16.mxu1 %v1584_v9  ;;  %v1467_v11 = vpack.c.bf16 %v1041_v8, %v1040_v10 }
 0x92c   :  { %1462 = vmatpush3.bf16.msra.mxu1 %v1461_v4 }
 0x92d   :  { %1463 = vmatprep.subr.bf16.mxu1 %v1584_v9 }
 0x930   :  { %1465 = vmatpush3.bf16.msra.mxu1 %v1464_v7 }
 0x931   :  { %1466 = vmatprep.subr.bf16.mxu1 %v1584_v9 }
 0x934   :  { %1468 = vmatpush3.bf16.msra.mxu1 %v1467_v11 }
 0x935   :  { %1469 = vmatprep.subr.bf16.mxu1 %v1584_v9 }
 0x938   :  { %1471 = vmatpush3.bf16.msra.mxu1 %v1470_v14 }
 0x939   :  { %1472 = vmatprep.subr.bf16.mxu1 %v1584_v9 }
 0x93c   :  { %1474 = vmatpush3.bf16.msra.mxu1 %v1473_v17 }
 0x93d   :  { %1475 = vmatprep.subr.bf16.mxu1 %v1584_v9 }
 0x940   :  { %1477 = vmatpush3.bf16.msra.mxu1 %v1476_v21 }
 0x941   :  { %1478 = vmatprep.subr.bf16.mxu1 %v1584_v9 }
 0x944   :  { %1480 = vmatpush3.bf16.msra.mxu1 %v1479_v24 }
 0x947   :  { %1422 = vmatmul.mubr.f32.vlgmr.msra.gmra.mrb[6].mxu1 %v245_v26 }
 0x9f4   :  { %v910_v32 = vpop.f32.mrb[2].mxu1 }
 0x9f5   :  { %v914_v33 = vsub.f32 0.0, %v910_v32  ;;  %v1383_v34 = vpop.f32.mrb[3].mxu1 }
 0x9f7   :  { %v915_v35 = vmul.f32 1.442695, %v914_v33 }
 0x9f9   :  { %1511 = vpow2.f32 %v915_v35 }
 0x9fa   :  { %v1004_v36 = vpop.f32.mrb[4].mxu1 }
 0x9fb   :  { %v1008_v37 = vsub.f32 0.0, %v1004_v36  ;;  %v1388_v38 = vpop.f32.mrb[5].mxu1 }
 0x9fd   :  { %v1009_v39 = vmul.f32 1.442695, %v1008_v37 }
 0x9ff   :  { %1513 = vpow2.f32 %v1009_v39 }
 0xa03   :  { %v1512_v9 = vpop.eup %1511 }
 0xa04   :  { %v917_v40 = vadd.f32 1.0, %v1512_v9 }
 0xa06   :  { %1515 = vrcp.f32 %v917_v40 }
 0xa09   :  { %v1514_v41 = vpop.eup %1513 }
 0xa0a   :  { %v1011_v42 = vadd.f32 1.0, %v1514_v41 }
 0xa0c   :  { %1517 = vrcp.f32 %v1011_v42 }
 0xa10   :  { %v1516_v43 = vpop.eup %1515 }
 0xa11   :  { %v919_v44 = vadd.f32 0.01, %v1516_v43  ;;  %v922_v45 = vsub.f32 1.01, %v1516_v43 }
 0xa13   :  { %1519 = vlog2.f32 %v919_v44 }
 0xa14   :  { %1521 = vlog2.f32 %v922_v45 }
 0xa16   :  { %v1518_v46 = vpop.eup %1517 }
 0xa17   :  { %v1013_v47 = vadd.f32 0.01, %v1518_v46  ;;  %v1016_v48 = vsub.f32 1.01, %v1518_v46 }
 0xa19   :  { %1523 = vlog2.f32 %v1013_v47 }
 0xa1a   :  { %1525 = vlog2.f32 %v1016_v48  ;;  %v1123_v52 = vpop.f32.mrb[6].mxu1 }
 0xa1b   :  { %v1124_v53 = vadd.f32 %v1264_v49, %v1123_v52  ;;  %v1423_v54 = vpop.f32.mrb[7].mxu1 }
 0xa1d   :  { %v1520_v50 = vpop.eup %1519  ;;  %v1127_v55 = vmax.f32 %v1124_v53, 0.0 }
 0xa1e   :  { %v1522_v56 = vpop.eup %1521  ;;  %v921_v57 = vmul.f32 0.6931472, %v1520_v50 }
 0xa1f   :  { %v924_v58 = vmul.f32 0.6931472, %v1522_v56  ;;  %1433 = vmatmul.mubr.msk.f32.vlgmr.msra.gmra.mrb[14].mxu0 %vm174_vm3, %v1127_v55 }
 0xa21   :  { %v925_v51 = vsub.f32 %v921_v57, %v924_v58 }
 0xa23   :  { %v1524_v61 = vpop.eup %1523  ;;  %v927_v62 = vadd.f32 %v926_v59, %v925_v51 }
 0xa24   :  { %v1526_v63 = vpop.eup %1525  ;;  %v1015_v0 = vmul.f32 0.6931472, %v1524_v61 }
 0xa25   :  { %v1018_v1 = vmul.f32 0.6931472, %v1526_v63  ;;  %v929_v2 = vsub.f32 %v927_v62, %v928_v60 }
 0xa27   :  { %v1019_v4 = vsub.f32 %v1015_v0, %v1018_v1  ;;  %v930_v5 = vsub.f32 0.0, %v929_v2 }
 0xa29   :  { %v931_v7 = vmul.f32 1.442695, %v930_v5  ;;  %v1022_v10 = vadd.f32 %v1262_v3, %v1019_v4 }
 0xa2b   :  { %v1025_v8 = vsub.f32 %v1022_v10, %v1263_v6  ;;  %1527 = vpow2.f32 %v931_v7 }
 0xa2d   :  { %v1026_v11 = vsub.f32 0.0, %v1025_v8 }
 0xa2f   :  { %v1027_v12 = vmul.f32 1.442695, %v1026_v11 }
 0xa31   :  { %1529 = vpow2.f32 %v1027_v12 }
 0xa35   :  { %v1528_v13 = vpop.eup %1527 }
 0xa36   :  { %v933_v14 = vadd.f32 1.0, %v1528_v13 }
 0xa38   :  { %1531 = vrcp.f32 %v933_v14 }
 0xa3b   :  { %v1530_v15 = vpop.eup %1529 }
 0xa3c   :  { %v1029_v16 = vadd.f32 1.0, %v1530_v15 }
 0xa3e   :  { %1533 = vrcp.f32 %v1029_v16 }
 0xa42   :  { %v1532_v17 = vpop.eup %1531 }
 0xa48   :  { %v1534_v19 = vpop.eup %1533 }
 0xa49   :  { %v1031_v20 = vadd.f32 %v1534_v19, %v1532_v17 }
 0xa4b   :  { %v1032_v21 = vmul.f32 0.5, %v1031_v20 }
 0xa4d   :  { %1033 = vst.msk [vmem:[#allocation4] sm:$0xff] %vm249_vm4, %v1032_v21 }
 0xa4e   :  { %1546 = shalt.err (!%p1543_p4)
}
 0xa4f   :  { %s1547_s26 = scalar_lea.hbm %s1975_s20, 128 }
 0xa50   :  { %p1548_p5 = scmp.ne.s32.totalorder %s1975_s20, %s1547_s26  ;;  %p1551_p6 = scmp.lt.u32.totalorder %s1547_s26, %s1975_s20 }
 0xa52   :  { %p1553_p7 = pnand %p1551_p6, %p1548_p5 }
 0xa54   :  { %1556 = shalt.err (!%p1553_p7)
}
 0xa55   :  { %1233 = dma.vmem_to_hbm [thread:$0]  %s1231_s18, 128, %s1975_s20, [#allocation5]   ;;  %v1265_v22 = vld [vmem:[%s1969_s14] ss:$0 sm:$0xff]  ;;  %vm1212_vm9 = vcmask 17408  }
 0xa56   :  { %s1590_s11 = smov [#allocation2]  }
 0xa57   :  { %s1220_s21 = sshll.u32 %s1590_s11, 4  ;;  %s1221_s21 = int_to_ptr.vmem [resolvable:$true] %s1220_s21 }
 0xa58   :  { %s1557_s6 = scalar_lea.vmem %s1221_s21, 32  ;;  %p1562_p9 = scmp.lt.s32.totalorder %s1221_s21, %s1221_s21 }
 0xa59   :  { %p1558_p8 = scmp.ne.s32.totalorder %s1221_s21, %s1557_s6  ;;  %p1563_p10 = scmp.lt.s32.totalorder %s1557_s6, %s1557_s6 }
 0xa5b   :  { %p1564_p11 = por %p1563_p10, %p1562_p9 }
 0xa5d   :  { %p1565_p12 = pnand %p1564_p11, %p1558_p8 }
 0xaf2   :  { %v1208_v23 = vpop.f32.mrb[14].mxu0 }
 0xaf3   :  { %v1209_v24 = vadd.f32 %v1265_v22, %v1208_v23  ;;  %v1434_v25 = vpop.f32.mrb[15].mxu0 }
 0xaf5   :  { %1213 = vst.msk [vmem:[#allocation2] sm:$0x3] %vm1212_vm9, %v1209_v24 }
 0xaf6   :  { %1568 = shalt.err (!%p1565_p12)
}
 0xaf7   :  { %s1569_s13 = scalar_lea.hbm %s1974_s19, 32 }
 0xaf8   :  { %p1570_p13 = scmp.ne.s32.totalorder %s1974_s19, %s1569_s13  ;;  %p1573_p0 = scmp.lt.u32.totalorder %s1569_s13, %s1974_s19 }
 0xafa   :  { %p1575_p1 = pnand %p1573_p0, %p1570_p13 }
 0xafc   :  { %1578 = shalt.err (!%p1575_p1)
}
 0xafd   :  { %1223 = dma.vmem_to_hbm [thread:$0]  %s1221_s21, 32, %s1974_s19, [#allocation3]  }
 0xafe   :  { %1579 = dma.done.wait [#allocation3], 32  }
 0xaff   :  { %1580 = vsyncadd [#allocation3], 4294967264 }
 0xb00   :  { %1581 = dma.done.wait [#allocation5], 128  }
 0xb01   :  { %1582 = vsyncadd [#allocation5], 4294967168 }
 0xb02   :  { %1240 = vsyncpa [#allocation3], 1 }
 0xb03   :  { %1241 = vsyncpa [#allocation5], 1 }

</bundles_post_ra>
